<compile_context>
chip_gen: v5e
topology: v5e:2x2
jax: 0.10.0
libtpu: 0.0.40
codegen_flags: <defaults>
</compile_context>

<pallas_src>
import functools

import jax
import jax.numpy as jnp
from jax import lax
from jax.experimental import pallas as pl
from jax.experimental.pallas import tpu as pltpu


def _round_up(v, m):
    return ((v + m - 1) // m) * m


def _pick_block_s(s_total, c_in, c_mid, budget_bytes=24 << 20):
    """Spatial tile size and zero-pad amount.

    VMEM per spatial element (f32 temporaries):
      2 x double-buffered x tile rows (Cin sublane-padded to 8)
      2 x (C, block_s) activation temporaries (dot output + relu output)
    The budget keeps the tile data <= ~24 MiB so it also fits v7x (64 MiB part,
    32 MiB default scoped) with double-buffering alive.
    """
    per_s = (2 * _round_up(c_in, 8) + 2 * _round_up(c_mid, 8)) * 4
    cap = max(128, (budget_bytes // per_s) // 128 * 128)
    if s_total <= cap:
        return s_total, 0
    for cand in range(cap, 0, -128):
        if s_total % cand == 0:
            return cand, 0
    # No 128-multiple divisor of S fits the budget: tile at `cap` and zero-pad
    # S up to a multiple (one extra XLA pad pass over x for awkward shapes;
    # the kernel subtracts the padded columns' relu(-b) contribution exactly).
    pad = (-s_total) % cap
    return cap, pad


# -----------------------------------------------------------------------------
# Fused kernel: encoder (pointwise conv + bias-folded ReLU + global mean pool),
# concatenated 1x1x1 conv heads, and tril/diag assembly of L.
#
# Grid = (B, S_pad // block_s); batch axis "parallel", spatial axis "arbitrary"
# (reduction into the (C, 1) accumulator scratch).
# -----------------------------------------------------------------------------
def _fused_kernel(x_ref, wT_ref, nbenc_ref, wh_ref, bh_ref, o_ref, acc_ref, *,
                  latent_size, n_components, total_s, pad_s, out_pad):
    Lsz = latent_size
    nc = n_components
    LL = Lsz * Lsz
    s_idx = pl.program_id(1)

    @pl.when(s_idx == 0)
    def _init():
        acc_ref[...] = jnp.zeros_like(acc_ref)

    # ---- encoder tile: pointwise conv (MXU) + bias-folded ReLU + partial sum.
    # max(Wx + b, 0) == max(Wx, -b) + b  ->  "+b" is applied once in the
    # epilogue, deleting one VPU pass over the (C, block_s) activation.
    x_b = x_ref[0]                                              # (Cin, block_s)
    act = jnp.dot(wT_ref[...], x_b,
                  preferred_element_type=jnp.float32)           # (C, block_s) f32
    act = jnp.maximum(act, nbenc_ref[...])                      # nbenc = -b (C,1)
    # NOTE: an MXU ones-column reduction (act @ ones(block_s, 1)) was evaluated
    # but rejected: the (block_s, 1) operand lane-pads to 128 lanes in VMEM
    # (512x blow-up). jnp.sum is one VPU lane-accumulate pass + a tiny XLU
    # cross-lane reduce, which is the cheapest viable reduction here.
    acc_ref[...] += jnp.sum(act, axis=1, keepdims=True)         # (C, 1)

    # ---- epilogue on the last spatial tile: heads + tril assembly -----------
    @pl.when(s_idx == pl.num_programs(1) - 1)
    def _epilogue():
        acc = acc_ref[...]
        if pad_s:
            # zero-padded spatial columns each contributed max(0, -b) = relu(-b)
            acc = acc - float(pad_s) * jnp.maximum(nbenc_ref[...], 0.0)
        # global mean pool over the true S, plus the deferred bias:
        h_col = acc * (1.0 / float(total_s)) - nbenc_ref[...]   # (C, 1)

        # Fused heads in row orientation (lane-dense), without any transpose:
        # head[0, p] = sum_c h[c] * w_all[c, p]  (broadcast-mul + sublane reduce;
        # tiny, epilogue-only).
        head = jnp.sum(h_col * wh_ref[...], axis=0, keepdims=True) + bh_ref[...]
        # head: (1, Pw) = [mean_log_sigma | cov_tril | (mixture)] lane-padded.

        n_ms = nc * 2 * Lsz

        # Row-major (L, L) flat-index helpers, built without reshape/transpose:
        e_r = lax.broadcasted_iota(jnp.int32, (Lsz, LL), 0)     # row candidate r
        e_k = lax.broadcasted_iota(jnp.int32, (Lsz, LL), 1)     # flat index k
        # diag_sel[r, k] = 1 iff flat index k is the r-th diagonal entry
        diag_sel = (e_k == e_r * (Lsz + 1)).astype(jnp.float32)       # (Lsz, LL)
        # strict_row[0, k] = 1 iff flat index k lies strictly below the diagonal
        strict_row = jnp.sum(
            ((e_k >= e_r * Lsz) & (e_k < e_r * (Lsz + 1))).astype(jnp.float32),
            axis=0, keepdims=True)                                    # (1, LL)

        pieces = []
        for g in range(nc):                                     # static unroll
            pieces.append(head[:, g * 2 * Lsz: g * 2 * Lsz + Lsz])    # mu_g
        for g in range(nc):
            ls_g = head[:, g * 2 * Lsz + Lsz: (g + 1) * 2 * Lsz]      # (1, Lsz)
            cov_g = head[:, n_ms + g * LL: n_ms + (g + 1) * LL]       # (1, LL)
            diag_vals = jnp.exp(ls_g) + 0.0001                        # (1, Lsz)
            diag_flat = jnp.dot(diag_vals, diag_sel,
                                preferred_element_type=jnp.float32)   # (1, LL)
            pieces.append(strict_row * cov_g + diag_flat)             # L_flat_g
        if nc > 1:
            off = n_ms + nc * LL
            # raw (un-normalized) mixture weights, matching the torch module
            pieces.append(head[:, off: off + nc])
        if out_pad:
            pieces.append(jnp.zeros((1, out_pad), jnp.float32))

        # single unmasked lane-dense store of the whole per-batch result row
        o_ref[0] = jnp.concatenate(pieces, axis=1)              # (1, Po)


# -----------------------------------------------------------------------------
# Wrapper: layout prep (free reshape / tiny weight concat) + pallas_call.
# -----------------------------------------------------------------------------
@functools.partial(jax.jit, static_argnames=("latent_size", "n_components"))
def full_cov_conv_gaussian_encoder(x, params, *, latent_size, n_components):
    B, Cin = x.shape[0], x.shape[1]
    S = x.shape[2] * x.shape[3] * x.shape[4]
    Lsz, nc = latent_size, n_components

    # Free reshape NCDHW -> (B, Cin, S): spatial axis on lanes, no transpose.
    # x is consumed in its incoming dtype; do NOT cast here (a wrapper-side
    # cast adds an extra HBM pass). Feed bf16 x to halve the dominant stream.
    x3 = x.reshape(B, Cin, S)

    w_enc = params["w_enc"]                                     # (Cin, C)
    C = w_enc.shape[1]
    wT = w_enc.T.astype(x3.dtype)                               # (C, Cin)
    nbenc = (-params["b_enc"]).reshape(C, 1).astype(jnp.float32)  # -b  (C, 1)

    # Concatenated 1x1x1 conv heads, lane-padded to a multiple of 128 columns.
    n_ms = nc * 2 * Lsz
    n_ct = nc * Lsz * Lsz
    n_mw = nc if nc > 1 else 0
    n_head = n_ms + n_ct + n_mw
    Pw = _round_up(n_head, 128)

    w_list = [params["w_ms"], params["w_ct"]]
    b_list = [params["b_ms"], params["b_ct"]]
    if nc > 1:
        w_list.append(params["w_mw"])
        b_list.append(params["b_mw"])
    w_all = jnp.pad(jnp.concatenate(w_list, axis=1).astype(jnp.float32),
                    ((0, 0), (0, Pw - n_head)))                 # (C, Pw) no .T
    b_all = jnp.pad(jnp.concatenate(b_list, axis=1).astype(jnp.float32),
                    ((0, 0), (0, Pw - n_head)))                 # (1, Pw)

    n_out = nc * Lsz + nc * Lsz * Lsz + n_mw                    # [mu|L_flat|mw]
    Po = _round_up(n_out, 128)

    block_s, pad_s = _pick_block_s(S, Cin, C)
    if pad_s:
        x3 = jnp.pad(x3, ((0, 0), (0, 0), (0, pad_s)))          # awkward S only
    S_pad = S + pad_s
    grid = (B, S_pad // block_s)

    kernel = functools.partial(
        _fused_kernel, latent_size=Lsz, n_components=nc, total_s=S,
        pad_s=pad_s, out_pad=Po - n_out)

    # Explicit VMEM budget: x double-buffer (Cin sublane-padded) + two
    # (C, block_s) f32 temporaries + resident weights; capped under v7x 64 MiB.
    elem = jnp.dtype(x3.dtype).itemsize
    vmem_need = (2 * _round_up(Cin, 8) * block_s * elem
                 + 2 * _round_up(C, 8) * block_s * 4
                 + 2 * (C * Cin * elem + 128 * C + C * Pw * 4 + Pw * 4 + Po * 4))
    vmem_limit = int(min(48 << 20, max(vmem_need + (4 << 20), 16 << 20)))

    out = pl.pallas_call(
        kernel,
        out_shape=jax.ShapeDtypeStruct((B, 1, Po), jnp.float32),
        grid=grid,
        in_specs=[
            pl.BlockSpec((1, Cin, block_s), lambda b, s: (b, 0, s)),
            pl.BlockSpec((C, Cin), lambda b, s: (0, 0)),
            pl.BlockSpec((C, 1), lambda b, s: (0, 0)),
            pl.BlockSpec((C, Pw), lambda b, s: (0, 0)),
            pl.BlockSpec((1, Pw), lambda b, s: (0, 0)),
        ],
        out_specs=pl.BlockSpec((1, 1, Po), lambda b, s: (b, 0, 0)),
        scratch_shapes=[pltpu.VMEM((C, 1), jnp.float32)],
        compiler_params=pltpu.CompilerParams(
            # batch axis "parallel" (megacore-shardable); spatial = reduction.
            # TODO(synk): on v7x (2 TCs) B=1 leaves one core idle; a 2-way
            # parallel spatial split + tiny combine pass would fix that.
            dimension_semantics=("parallel", "arbitrary"),
            vmem_limit_bytes=vmem_limit),
    )(x3, wT, nbenc, w_all, b_all)

    out2 = out[:, 0, :]                                         # (B, Po)
    mu = out2[:, :nc * Lsz].reshape(B, nc, Lsz)
    L = out2[:, nc * Lsz: nc * Lsz + nc * Lsz * Lsz].reshape(B, nc, Lsz, Lsz)
    if nc > 1:
        base = nc * Lsz + nc * Lsz * Lsz
        mixture_weights = out2[:, base: base + nc]
    else:
        mixture_weights = None
    return L, mu, mixture_weights


# -----------------------------------------------------------------------------
# Pure-JAX reference (for correctness check only)
# -----------------------------------------------------------------------------
def _reference(x, params, latent_size, n_components):
    B = x.shape[0]
    Lsz, nc = latent_size, n_components
    x2d = jnp.transpose(x, (0, 2, 3, 4, 1)).reshape(B, -1, x.shape[1])
    act = jnp.maximum(jnp.einsum("bsc,cf->bsf", x2d, params["w_enc"])
                      + params["b_enc"][None], 0.0)
    h = jnp.mean(act, axis=1)
    mls = h @ params["w_ms"] + params["b_ms"]
    cov = h @ params["w_ct"] + params["b_ct"]
    mls3 = mls.reshape(B, nc, 2 * Lsz)
    mu = mls3[:, :, :Lsz]
    log_sigma = mls3[:, :, Lsz:].reshape(B * nc, Lsz)
    cov3 = cov.reshape(B * nc, Lsz, Lsz)
    L_hat = jnp.tril(cov3, k=-1)
    L = L_hat + jnp.eye(Lsz)[None] * (jnp.exp(log_sigma) + 0.0001)[:, :, None]
    return L.reshape(B, nc, Lsz, Lsz), mu


if __name__ == "__main__":
    # Module hyperparameters (small, but consistent with the torch __init__):
    in_channels = 4
    latent_size = 8
    n_components = 1
    depth = 3
    num_feature_maps = 8
    feature_map_multiplier = 2
    num_filters = num_feature_maps * feature_map_multiplier ** (depth - 1)  # 32

    B, D, H, W = 2, 4, 8, 8

    key = jax.random.PRNGKey(0)
    keys = jax.random.split(key, 8)

    params = {
        # synthetic encoder (pointwise conv weights)
        "w_enc": 0.1 * jax.random.normal(
            keys[0], (in_channels, num_filters), jnp.float32),
        "b_enc": 0.1 * jax.random.normal(keys[1], (1, num_filters), jnp.float32),
        # mean_log_sigma_op : Conv3d(num_filters, nc*2*latent, 1)
        "w_ms": 0.1 * jax.random.normal(
            keys[2], (num_filters, n_components * 2 * latent_size), jnp.float32),
        "b_ms": 0.1 * jax.random.normal(
            keys[3], (1, n_components * 2 * latent_size), jnp.float32),
        # cov_tril_op : Conv3d(num_filters, nc*latent*latent, 1)
        "w_ct": 0.1 * jax.random.normal(
            keys[4], (num_filters, n_components * latent_size * latent_size),
            jnp.float32),
        "b_ct": 0.1 * jax.random.normal(
            keys[5], (1, n_components * latent_size * latent_size), jnp.float32),
    }

    x = jax.random.normal(keys[6], (B, in_channels, D, H, W), jnp.float32)

    L, mu, mixture_weights = full_cov_conv_gaussian_encoder(
        x, params, latent_size=latent_size, n_components=n_components)
    L = jax.block_until_ready(L)
    mu = jax.block_until_ready(mu)

    L_ref, mu_ref = _reference(x, params, latent_size, n_components)
    assert L.shape == (B, n_components, latent_size, latent_size)
    assert mu.shape == (B, n_components, latent_size)
    assert mixture_weights is None
    assert jnp.allclose(L, L_ref, atol=1e-5, rtol=1e-5), \
        float(jnp.max(jnp.abs(L - L_ref)))
    assert jnp.allclose(mu, mu_ref, atol=1e-5, rtol=1e-5), \
        float(jnp.max(jnp.abs(mu - mu_ref)))

    print("KERNEL_OK")
</pallas_src>

<mosaic_0001>
module attributes {stable_mosaic.version = 11 : i64} {
  func.func @_fused_kernel(%arg0: i32, %arg1: i32, %arg2: memref<1x4x256xf32, #tpu.memory_space<vmem>>, %arg3: memref<32x4xf32, #tpu.memory_space<vmem>>, %arg4: memref<32x1xf32, #tpu.memory_space<vmem>>, %arg5: memref<32x128xf32, #tpu.memory_space<vmem>>, %arg6: memref<1x128xf32, #tpu.memory_space<vmem>>, %arg7: memref<1x1x128xf32, #tpu.memory_space<vmem>>, %arg8: memref<32x1xf32, #tpu.memory_space<vmem>>) attributes {dimension_semantics = [#tpu.dimension_semantics<parallel>, #tpu.dimension_semantics<arbitrary>], iteration_bounds = array<i64: 2, 1>, scalar_prefetch = 0 : i64, scratch_operands = 1 : i64, tpu.core_type = #tpu.core_type<tc>, window_params = [{transform_indices = @transform_0, window_bounds = array<i64: 1, 4, 256>}, {pipeline_mode = #tpu.pipeline_mode<synchronous>, transform_indices = @transform_1, window_bounds = array<i64: 32, 4>}, {pipeline_mode = #tpu.pipeline_mode<synchronous>, transform_indices = @transform_2, window_bounds = array<i64: 32, 1>}, {pipeline_mode = #tpu.pipeline_mode<synchronous>, transform_indices = @transform_3, window_bounds = array<i64: 32, 128>}, {pipeline_mode = #tpu.pipeline_mode<synchronous>, transform_indices = @transform_4, window_bounds = array<i64: 1, 128>}, {transform_indices = @transform_5, window_bounds = array<i64: 1, 1, 128>}]} {
    %c0_i32 = arith.constant 0 : i32
    %0 = arith.cmpi eq, %arg1, %c0_i32 : i32
    %1 = arith.extui %0 : i1 to i32
    %c0_i32_0 = arith.constant 0 : i32
    %2 = arith.cmpi ne, %1, %c0_i32_0 : i32
    scf.if %2 {
      %cst_14 = arith.constant 0.000000e+00 : f32
      %18 = vector.broadcast %cst_14 : f32 to vector<32x1xf32>
      %c0_15 = arith.constant 0 : index
      %c0_16 = arith.constant 0 : index
      %19 = vector.load %arg8[%c0_15, %c0_16] : memref<32x1xf32, #tpu.memory_space<vmem>>, vector<32x1xf32>
      tpu.vector_store %arg8[%c0_15, %c0_16], %18 {strides = array<i32>} : memref<32x1xf32, #tpu.memory_space<vmem>>, vector<32x1xf32>,
    } else {
    }
    %c0 = arith.constant 0 : index
    %c0_1 = arith.constant 0 : index
    %c0_2 = arith.constant 0 : index
    %3 = vector.load %arg2[%c0, %c0_1, %c0_2] : memref<1x4x256xf32, #tpu.memory_space<vmem>>, vector<1x4x256xf32>
    %4 = vector.shape_cast %3 : vector<1x4x256xf32> to vector<4x256xf32>
    %c0_3 = arith.constant 0 : index
    %c0_4 = arith.constant 0 : index
    %5 = vector.load %arg3[%c0_3, %c0_4] : memref<32x4xf32, #tpu.memory_space<vmem>>, vector<32x4xf32>
    %cst = arith.constant dense<0.000000e+00> : vector<32x256xf32>
    %6 = tpu.matmul %5, %4, %cst {dimension_numbers = #tpu.dot_dimension_numbers<[1], [0], [0], [1], [0, 0, 1, 1], [], []>} : vector<32x4xf32>, vector<4x256xf32>, vector<32x256xf32> -> vector<32x256xf32>
    %c0_5 = arith.constant 0 : index
    %c0_6 = arith.constant 0 : index
    %7 = vector.load %arg4[%c0_5, %c0_6] : memref<32x1xf32, #tpu.memory_space<vmem>>, vector<32x1xf32>
    %8 = vector.broadcast %7 : vector<32x1xf32> to vector<32x256xf32>
    %9 = arith.maximumf %6, %8 : vector<32x256xf32>
    %c0_7 = arith.constant 0 : index
    %c0_8 = arith.constant 0 : index
    %10 = vector.load %arg8[%c0_7, %c0_8] : memref<32x1xf32, #tpu.memory_space<vmem>>, vector<32x1xf32>
    %cst_9 = arith.constant dense<0.000000e+00> : vector<32xf32>
    %11 = vector.multi_reduction <add>, %9, %cst_9 [1] : vector<32x256xf32> to vector<32xf32>
    %12 = vector.shape_cast %11 : vector<32xf32> to vector<32x1xf32>
    %13 = arith.addf %10, %12 : vector<32x1xf32>
    %c0_10 = arith.constant 0 : index
    %c0_11 = arith.constant 0 : index
    %14 = vector.load %arg8[%c0_10, %c0_11] : memref<32x1xf32, #tpu.memory_space<vmem>>, vector<32x1xf32>
    tpu.vector_store %arg8[%c0_10, %c0_11], %13 {strides = array<i32>} : memref<32x1xf32, #tpu.memory_space<vmem>>, vector<32x1xf32>,
    %c0_i32_12 = arith.constant 0 : i32
    %15 = arith.cmpi eq, %arg1, %c0_i32_12 : i32
    %16 = arith.extui %15 : i1 to i32
    %c0_i32_13 = arith.constant 0 : i32
    %17 = arith.cmpi ne, %16, %c0_i32_13 : i32
    scf.if %17 {
      %c0_14 = arith.constant 0 : index
      %c0_15 = arith.constant 0 : index
      %18 = vector.load %arg8[%c0_14, %c0_15] : memref<32x1xf32, #tpu.memory_space<vmem>>, vector<32x1xf32>
      %cst_16 = arith.constant 3.906250e-03 : f32
      %19 = vector.broadcast %cst_16 : f32 to vector<32x1xf32>
      %20 = arith.mulf %18, %19 : vector<32x1xf32>
      %c0_17 = arith.constant 0 : index
      %c0_18 = arith.constant 0 : index
      %21 = vector.load %arg4[%c0_17, %c0_18] : memref<32x1xf32, #tpu.memory_space<vmem>>, vector<32x1xf32>
      %22 = arith.subf %20, %21 : vector<32x1xf32>
      %c0_19 = arith.constant 0 : index
      %c0_20 = arith.constant 0 : index
      %23 = vector.load %arg5[%c0_19, %c0_20] : memref<32x128xf32, #tpu.memory_space<vmem>>, vector<32x128xf32>
      %24 = vector.broadcast %22 : vector<32x1xf32> to vector<32x128xf32>
      %25 = arith.mulf %24, %23 : vector<32x128xf32>
      %cst_21 = arith.constant dense<0.000000e+00> : vector<128xf32>
      %26 = vector.multi_reduction <add>, %25, %cst_21 [0] : vector<32x128xf32> to vector<128xf32>
      %27 = vector.shape_cast %26 : vector<128xf32> to vector<1x128xf32>
      %c0_22 = arith.constant 0 : index
      %c0_23 = arith.constant 0 : index
      %28 = vector.load %arg6[%c0_22, %c0_23] : memref<1x128xf32, #tpu.memory_space<vmem>>, vector<1x128xf32>
      %29 = arith.addf %27, %28 : vector<1x128xf32>
      %30 = tpu.iota {dimensions = array<i32: 0>} : vector<8x64xi32>
      %31 = tpu.iota {dimensions = array<i32: 1>} : vector<8x64xi32>
      %c9_i32 = arith.constant 9 : i32
      %32 = vector.broadcast %c9_i32 : i32 to vector<8x64xi32>
      %33 = arith.muli %30, %32 : vector<8x64xi32>
      %34 = arith.cmpi eq, %31, %33 : vector<8x64xi32>
      %35 = arith.extui %34 : vector<8x64xi1> to vector<8x64xi32>
      %36 = arith.sitofp %35 : vector<8x64xi32> to vector<8x64xf32>
      %c8_i32 = arith.constant 8 : i32
      %37 = vector.broadcast %c8_i32 : i32 to vector<8x64xi32>
      %38 = arith.muli %30, %37 : vector<8x64xi32>
      %39 = arith.cmpi sge, %31, %38 : vector<8x64xi32>
      %c9_i32_24 = arith.constant 9 : i32
      %40 = vector.broadcast %c9_i32_24 : i32 to vector<8x64xi32>
      %41 = arith.muli %30, %40 : vector<8x64xi32>
      %42 = arith.cmpi slt, %31, %41 : vector<8x64xi32>
      %43 = arith.andi %39, %42 : vector<8x64xi1>
      %44 = arith.extui %43 : vector<8x64xi1> to vector<8x64xi32>
      %45 = arith.sitofp %44 : vector<8x64xi32> to vector<8x64xf32>
      %cst_25 = arith.constant dense<0.000000e+00> : vector<64xf32>
      %46 = vector.multi_reduction <add>, %45, %cst_25 [0] : vector<8x64xf32> to vector<64xf32>
      %47 = vector.shape_cast %46 : vector<64xf32> to vector<1x64xf32>
      %48 = vector.extract_strided_slice %29 {offsets = [0, 0], sizes = [1, 8], strides = [1, 1]} : vector<1x128xf32> to vector<1x8xf32>
      %49 = vector.extract_strided_slice %29 {offsets = [0, 8], sizes = [1, 8], strides = [1, 1]} : vector<1x128xf32> to vector<1x8xf32>
      %50 = vector.extract_strided_slice %29 {offsets = [0, 16], sizes = [1, 64], strides = [1, 1]} : vector<1x128xf32> to vector<1x64xf32>
      %51 = math.exp %49 : vector<1x8xf32>
      %cst_26 = arith.constant 9.99999974E-5 : f32
      %52 = vector.broadcast %cst_26 : f32 to vector<1x8xf32>
      %53 = arith.addf %51, %52 : vector<1x8xf32>
      %cst_27 = arith.constant dense<0.000000e+00> : vector<1x64xf32>
      %54 = tpu.matmul %53, %36, %cst_27 {dimension_numbers = #tpu.dot_dimension_numbers<[1], [0], [0], [1], [0, 0, 1, 1], [], []>} : vector<1x8xf32>, vector<8x64xf32>, vector<1x64xf32> -> vector<1x64xf32>
      %55 = arith.mulf %47, %50 : vector<1x64xf32>
      %56 = arith.addf %55, %54 : vector<1x64xf32>
      %cst_28 = arith.constant 0.000000e+00 : f32
      %57 = vector.broadcast %cst_28 : f32 to vector<1x56xf32>
      %58 = tpu.concatenate %48, %56, %57 in 1 : vector<1x8xf32>, vector<1x64xf32>, vector<1x56xf32> -> vector<1x128xf32>
      %c0_29 = arith.constant 0 : index
      %c0_30 = arith.constant 0 : index
      %c0_31 = arith.constant 0 : index
      %59 = vector.load %arg7[%c0_29, %c0_30, %c0_31] : memref<1x1x128xf32, #tpu.memory_space<vmem>>, vector<1x1x128xf32>
      %60 = vector.shape_cast %59 : vector<1x1x128xf32> to vector<1x128xf32>
      %61 = vector.shape_cast %58 : vector<1x128xf32> to vector<1x1x128xf32>
      tpu.vector_store %arg7[%c0_29, %c0_30, %c0_31], %61 {strides = array<i32>} : memref<1x1x128xf32, #tpu.memory_space<vmem>>, vector<1x1x128xf32>,
    } else {
    }
    return
  }
  func.func @transform_0(%arg0: i32, %arg1: i32) -> (i32, i32, i32) {
    %c0_i32 = arith.constant 0 : i32
    %c0_i32_0 = arith.constant 0 : i32
    return %arg0, %c0_i32, %arg1 : i32, i32, i32
  }
  func.func @transform_1(%arg0: i32, %arg1: i32) -> (i32, i32) {
    %c0_i32 = arith.constant 0 : i32
    %c0_i32_0 = arith.constant 0 : i32
    %c0_i32_1 = arith.constant 0 : i32
    return %c0_i32, %c0_i32_0 : i32, i32
  }
  func.func @transform_2(%arg0: i32, %arg1: i32) -> (i32, i32) {
    %c0_i32 = arith.constant 0 : i32
    %c0_i32_0 = arith.constant 0 : i32
    %c0_i32_1 = arith.constant 0 : i32
    return %c0_i32, %c0_i32_0 : i32, i32
  }
  func.func @transform_3(%arg0: i32, %arg1: i32) -> (i32, i32) {
    %c0_i32 = arith.constant 0 : i32
    %c0_i32_0 = arith.constant 0 : i32
    %c0_i32_1 = arith.constant 0 : i32
    return %c0_i32, %c0_i32_0 : i32, i32
  }
  func.func @transform_4(%arg0: i32, %arg1: i32) -> (i32, i32) {
    %c0_i32 = arith.constant 0 : i32
    %c0_i32_0 = arith.constant 0 : i32
    %c0_i32_1 = arith.constant 0 : i32
    return %c0_i32, %c0_i32_0 : i32, i32
  }
  func.func @transform_5(%arg0: i32, %arg1: i32) -> (i32, i32, i32) {
    %c0_i32 = arith.constant 0 : i32
    %c0_i32_0 = arith.constant 0 : i32
    %c0_i32_1 = arith.constant 0 : i32
    return %arg0, %c0_i32, %c0_i32_0 : i32, i32, i32
  }
}

</mosaic_0001>

<bundles_post_ra>
// kernel: full_cov_conv_gaussian_encoder.1
= control target key start
LH: loop header
LB: loop body
LE: loop exit
PB: predicated region body
PF: predicated region fallthrough
CT: control target
= control target key end

     0   :  { %s705_s18 = smov 0   ;;  %s707_s19 = smov 0   ;;  %s820_s0 = inlined_call_operand.vmem [shape: f32[2,4,256], index: 0, kind: input, shape index: {}]   ;;  %s821_s1 = inlined_call_operand.vmem [shape: f32[32,4], index: 1, kind: input, shape index: {}]   ;;  %s822_s2 = inlined_call_operand.vmem [shape: f32[32,1], index: 2, kind: input, shape index: {}]   ;;  %s823_s3 = inlined_call_operand.vmem [shape: f32[32,128], index: 3, kind: input, shape index: {}]   ;;  %s824_s4 = inlined_call_operand.vmem [shape: f32[1,128], index: 4, kind: input, shape index: {}]   ;;  %s825_s5 = inlined_call_operand.vmem [shape: f32[2,1,128], index: 5, kind: output, shape index: {}]  }
   0x1   :  { %s709_s20 = smov 0  }
   0x2 LB: > { %s27_s21 = sadd.s32 1, %s663_s19  ;;  %p588_p0 = scmp.ge.s32.totalorder %s667_s20, 1  ;;  %s667_s20 = sphi %s709_s20, %s15_s20   ;;  %s663_s19 = sphi %s707_s19, %s827_s19   ;;  %s659_s18 = sphi %s705_s18, %s826_s18  }
   0x3   : > { %p29_p1 = scmp.ge.s32.totalorder %s27_s21, 2  ;;  %p206_p2 = scmp.lt.s32.totalorder %s667_s20, 3 }
   0x5   : > { %s829_s21 = smov (%p29_p1, %s27_s21), 0  ;;  %p207_p3 = pnand %p588_p0, %p206_p2 }
   0x6   : > { %p237_p4 = scmp.lt.s32.totalorder (!%p207_p3), %s659_s18, 1  ;;  %s671_s6 = smov (!%p207_p3), 112  }
   0x7   : > { %210 = sbr.rel (%p207_p3) target bundleno = 779 (0x30b), region = 40  ;;  %s672_s7 = smov (!%p207_p3), 120  }
   0x8   : > { %s674_s8 = smov (!%p207_p3), 8  }
   0xc   : > { %v669_v0 = vmov 0   ;;  %v726_v1 = vld [vmem:[%s822_s2] sm:$0xff]  ;;  %s831_s18 = smov (!%p237_p4, %s659_s18), 1  ;;  %v734_v2 = vld [vmem:[%s822_s2 + $0x10] sm:$0xff]  ;;  %v744_v4 = vld [vmem:[%s822_s2 + $0x8] sm:$0xff]  ;;  %vm280_vm0 = vcmask 1043456  }
   0xd   : > { %640 = vset.pattern.permute.xlu0 %v669_v0  ;;  %641 = vset.pattern.permute.xlu1 %v669_v0  ;;  %s607_s26 = sshll.u32 %s831_s18, 3  ;;  %v749_v5 = vld [vmem:[%s822_s2 + $0x18] sm:$0xff]  ;;  %v259_v6 = vld [vmem:[%s821_s1] sm:$0xff]  ;;  %vm267_vm1 = vcmask 31744   ;;  %v260_v7 = vld [vmem:[%s821_s1 + $0x8] sm:$0xff]  ;;  %vm253_vm2 = vcmask 7168   ;;  %s248_s11 = scalar_lea.vmem %s825_s5, %s831_s18 }
   0xe   : > { %349 = vperm.xlu0 %640, %v726_v1   ;;  %642 = vset.pattern.permute.xlu2 %v669_v0  ;;  %s244_s29 = scalar_lea.vmem %s820_s0, %s607_s26  ;;  %v261_v10 = vld [vmem:[%s821_s1 + $0x10] sm:$0xff]  ;;  %v262_v11 = vld [vmem:[%s821_s1 + $0x18] sm:$0xff]  ;;  %v670_v13 = vmov 0.0   ;;  %v419_v63 = vld [vmem:[%s823_s3] sm:$0xff]  ;;  %vm486_vm4 = vcmask 64512   ;;  %vm472_vm8 = vcmask 523264  }
   0xf   : > { %359 = vperm.xlu1 %641, %v734_v2   ;;  %v258_v3 = vld [vmem:[%s244_s29] sm:$0xff]  ;;  %255 = vst.msk [vmem:[#allocation2 + $0x8] sm:$0xff] %vm253_vm2, %v670_v13  ;;  %vm520_vm9 = vcmask 588800  }
  0x10   : > { %264 = vst [vmem:[#allocation1] ss:$2 sm:$0xff] %v258_v3 }
  0x11   : > { %254 = vst.msk [vmem:[#allocation2] sm:$0xff] %vm253_vm2, %v670_v13 }
  0x12   : > { %256 = vst.msk [vmem:[#allocation2 + $0x10] sm:$0xff] %vm253_vm2, %v670_v13 }
  0x13   : > { %257 = vst.msk [vmem:[#allocation2 + $0x18] sm:$0xff] %vm253_vm2, %v670_v13 }
  0x16   : > { %354 = vperm.xlu0 %640, %v744_v4   ;;  %v376_v37 = vld [vmem:[#allocation2 + $0x8] sm:$0xff] }
  0x17   : > { %364 = vperm.xlu1 %641, %v749_v5   ;;  %v265_v8 = vld.sshfl [vmem:[#allocation1] sm:$0xff pattern:$0x75316420]  ;;  %v266_v9 = vld.sshfl [vmem:[#allocation1 + $0x8] sm:$0xff pattern:$0x75316420] }
  0x18   : > { %591 = vmatpush.msk.msra.mxu0 %vm280_vm0, %v265_v8  ;;  %608 = vmatpush.msk.msra.mxu3 %vm280_vm0, %v265_v8  ;;  %v375_v40 = vld [vmem:[#allocation2] sm:$0xff] }
  0x19   : > { %609 = vmatpush.msk.msra.mxu1 %vm280_vm0, %v266_v9  ;;  %592 = vmatmul.msk.f32.vlgmr.msra.gmra.mxu0 %vm267_vm1, %v259_v6  ;;  %v377_v41 = vld [vmem:[#allocation2 + $0x10] sm:$0xff] }
  0x1a   : > { %593 = vmatmul.msk.f32.vlgmr.msra.gmra.mxu3 %vm267_vm1, %v260_v7  ;;  %598 = vmatmul.msk.f32.vlgmr.msra.gmra.mxu1 %vm267_vm1, %v260_v7  ;;  %v378_v49 = vld [vmem:[#allocation2 + $0x18] sm:$0xff] }
  0x1b   : > { %596 = vmatpush.msk.msrb.mxu0 %vm280_vm0, %v266_v9 }
  0x21   : > { %597 = vmatmul.msk.f32.vlgmr.msrb.gmra.mxu0 %vm267_vm1, %v259_v6 }
  0x22   : > { %594 = vmatmul.msk.f32.gmra.mxu3 %vm267_vm1, %v261_v10  ;;  %599 = vmatmul.msk.f32.gmra.mxu1 %vm267_vm1, %v261_v10 }
  0x2a   : > { %595 = vmatmul.msk.f32.gmra.mxu3 %vm267_vm1, %v262_v11  ;;  %600 = vmatmul.msk.f32.gmra.mxu1 %vm267_vm1, %v262_v11 }
  0x80   : > { %v350_v12 = vpop.permute.xlu0 %349 }
  0x81   : > { %v360_v20 = vpop.permute.xlu1 %359 }
  0x88   : > { %v355_v16 = vpop.permute.xlu0 %354 }
  0x89   : > { %v365_v31 = vpop.permute.xlu1 %364 }
  0x96   : > { %v302_v14 = vpop.f32.mrf.mxu0 }
  0x97   : > { %v334_v15 = vpop.f32.mrf.mxu1  ;;  %v367_v27 = vmax.f32 %v302_v14, %v350_v12 }
  0x98   : > { %v370_v18 = vmax.f32 %v334_v15, %v355_v16 }
  0x9d   : > { %v305_v17 = vpop.f32.mrf.mxu3 }
  0x9e   : > { %v369_v19 = vmax.f32 %v305_v17, %v355_v16  ;;  %v331_v23 = vpop.f32.mrf.mxu0 }
  0x9f   : > { %v337_v21 = vpop.f32.mrf.mxu1  ;;  %v368_v24 = vmax.f32 %v331_v23, %v350_v12 }
  0xa0   : > { %v382_v22 = vadd.f32 %v370_v18, %v369_v19  ;;  %v372_v25 = vmax.f32 %v337_v21, %v360_v20  ;;  %v456_v18 = vld [vmem:[%s824_s4] sm:$0x1] }
  0xa1   : > { %v379_v29 = vadd.f32 %v368_v24, %v367_v27  ;;  %v458_v24 = vlaneseq }
  0xa2   : > { %383 = vadd.xlane.f32.xlu2 %v382_v22 }
  0xa5   : > { %v308_v26 = vpop.f32.mrf.mxu3 }
  0xa6   : > { %v371_v28 = vmax.f32 %v308_v26, %v360_v20  ;;  %v461_v26 = vand.u32 127, %v458_v24 }
  0xa7   : > { %v340_v32 = vpop.f32.mrf.mxu1 }
  0xa8   : > { %v385_v30 = vadd.f32 %v372_v25, %v371_v28  ;;  %v374_v33 = vmax.f32 %v340_v32, %v365_v31  ;;  %v459_v25 = vshrl.u32 %v458_v24, 7  ;;  %v673_v28 = vmov 1.0  }
  0xaa   : > { %380 = vadd.xlane.f32.xlu2 %v379_v29  ;;  %386 = vadd.xlane.f32.xlu0 %v385_v30  ;;  %v462_v27 = vmul.u32 9, %v459_v25  ;;  %v466_v30 = vmul.u32 8, %v459_v25 }
  0xac   : > { %vm463_vm3 = vcmp.eq.s32.totalorder %v461_v26, %v462_v27  ;;  %vm467_vm5 = vcmp.ge.s32.totalorder %v461_v26, %v466_v30  ;;  %vm468_vm6 = vcmp.lt.s32.totalorder %v461_v26, %v462_v27 }
  0xad   : > { %v311_v34 = vpop.f32.mrf.mxu3  ;;  %603 = vmatpush.msk.msra.mxu2 %vm463_vm3, %v673_v28  ;;  %vm469_vm7 = vmand %vm467_vm5, %vm468_vm6 }
  0xae   : > { %v373_v35 = vmax.f32 %v311_v34, %v365_v31  ;;  %v602_v31 = vsel %vm469_vm7, 1.0, %v670_v13 }
  0xaf   : > { %v473_v32 = vsel %vm472_vm8, %v602_v31, 0.0 }
  0xb0   : > { %v388_v36 = vadd.f32 %v374_v33, %v373_v35  ;;  %v474_v33 = vrot.slane %v473_v32, 4 }
  0xb2   : > { %389 = vadd.xlane.f32.xlu1 %v388_v36  ;;  %v475_v34 = vadd.f32 %v474_v33, %v473_v32 }
  0xb4   : > { %v476_v35 = vrot.slane %v475_v34, 2 }
  0xb6   : > { %v477_v36 = vadd.f32 %v476_v35, %v475_v34 }
 0x115   : > { %v384_v38 = vpop.xlane.xlu2 %383 }
 0x116   : > { %v392_v39 = vadd.f32 %v384_v38, %v376_v37  ;;  %v478_v37 = vrot.slane %v477_v36, 1 }
 0x118   : > { %397 = vst.msk [vmem:[#allocation2 + $0x8] sm:$0xff] %vm253_vm2, %v392_v39  ;;  %v479_v38 = vadd.f32 %v478_v37, %v477_v36 }
 0x11d   : > { %v381_v42 = vpop.xlane.xlu2 %380  ;;  %v387_v43 = vpop.xlane.xlu0 %386 }
 0x11e   : > { %v391_v44 = vadd.f32 %v381_v42, %v375_v40  ;;  %v393_v45 = vadd.f32 %v387_v43, %v377_v41 }
 0x11f   : > { %v404_v46 = vld [vmem:[#allocation2 + $0x8] sm:$0xff] }
 0x120   : > { %396 = vst.msk [vmem:[#allocation2] sm:$0xff] %vm253_vm2, %v391_v44  ;;  %v408_v47 = vmul.f32 0.00390625, %v404_v46 }
 0x121   : > { %398 = vst.msk [vmem:[#allocation2 + $0x10] sm:$0xff] %vm253_vm2, %v393_v45 }
 0x122   : > { %v416_v48 = vsub.f32 %v408_v47, %v744_v4 }
 0x124   : > { %430 = vperm.xlu2 %642, %v416_v48  }
 0x125   : > { %v390_v50 = vpop.xlane.xlu1 %389 }
 0x126   : > { %v394_v51 = vadd.f32 %v390_v50, %v378_v49 }
 0x127   : > { %v403_v52 = vld [vmem:[#allocation2] sm:$0xff] }
 0x128   : > { %399 = vst.msk [vmem:[#allocation2 + $0x18] sm:$0xff] %vm253_vm2, %v394_v51  ;;  %v407_v53 = vmul.f32 0.00390625, %v403_v52  ;;  %v405_v54 = vld [vmem:[#allocation2 + $0x10] sm:$0xff] }
 0x129   : > { %v409_v56 = vmul.f32 0.00390625, %v405_v54 }
 0x12a   : > { %v415_v55 = vsub.f32 %v407_v53, %v726_v1  ;;  %v420_v1 = vld [vmem:[%s823_s3 + $0x8] sm:$0xff] }
 0x12b   : > { %v417_v57 = vsub.f32 %v409_v56, %v734_v2  ;;  %v421_v2 = vld [vmem:[%s823_s3 + $0x10] sm:$0xff] }
 0x12c   : > { %425 = vperm.xlu2 %642, %v415_v55  }
 0x12f   : > { %v406_v58 = vld [vmem:[#allocation2 + $0x18] sm:$0xff] }
 0x130   : > { %v410_v59 = vmul.f32 0.00390625, %v406_v58 }
 0x132   : > { %v418_v60 = vsub.f32 %v410_v59, %v749_v5  ;;  %v422_v5 = vld [vmem:[%s823_s3 + $0x18] sm:$0xff] }
 0x134   : > { %435 = vperm.xlu2 %642, %v417_v57  }
 0x13c   : > { %440 = vperm.xlu2 %642, %v418_v60  }
 0x17e   : > { %v431_v61 = vpop.permute.xlu2 %430 }
 0x17f   : > { %v444_v4 = vmul.f32 %v431_v61, %v420_v1 }
 0x186   : > { %v426_v62 = vpop.permute.xlu2 %425 }
 0x187   : > { %v443_v3 = vmul.f32 %v426_v62, %v419_v63 }
 0x189   : > { %v447_v7 = vadd.f32 %v444_v4, %v443_v3 }
 0x18e   : > { %v436_v0 = vpop.permute.xlu2 %435 }
 0x18f   : > { %v445_v6 = vmul.f32 %v436_v0, %v421_v2 }
 0x191   : > { %v448_v9 = vadd.f32 %v447_v7, %v445_v6 }
 0x196   : > { %v441_v8 = vpop.permute.xlu2 %440 }
 0x197   : > { %v446_v10 = vmul.f32 %v441_v8, %v422_v5 }
 0x199   : > { %v449_v11 = vadd.f32 %v448_v9, %v446_v10 }
 0x19b   : > { %v450_v12 = vrot.slane %v449_v11, 4 }
 0x19d   : > { %v451_v14 = vadd.f32 %v450_v12, %v449_v11 }
 0x19f   : > { %v452_v15 = vrot.slane %v451_v14, 2 }
 0x1a1   : > { %v453_v16 = vadd.f32 %v452_v15, %v451_v14 }
 0x1a3   : > { %v454_v17 = vrot.slane %v453_v16, 1 }
 0x1a5   : > { %v455_v19 = vadd.f32 %v454_v17, %v453_v16 }
 0x1a7   : > { %v457_v20 = vadd.f32 %v456_v18, %v455_v19 }
 0x1a9   : > { %510 = vrot.lane.b32.xlu1 %v457_v20, %s671_s6  ;;  %v480_v21 = vmul.f32 1.442695, %v457_v20 }
 0x1ab   : > { %643 = vpow2.f32 %v480_v21 }
 0x1b1   : > { %v644_v22 = vpop.eup %643 }
 0x1b2   : > { %v482_v23 = vadd.f32 0.0001, %v644_v22 }
 0x1b4   : > { %484 = vrot.lane.b32.xlu0 %v482_v23, %s672_s7 }
 0x21b   : > { %v511_v39 = vpop.permute.xlu1 %510 }
 0x21c   : > { %v513_v40 = vmul.f32 %v511_v39, %v479_v38 }
 0x226   : > { %v485_v29 = vpop.permute.xlu0 %484 }
 0x227   : > { %604 = vmatmul.msk.f32.vlgmr.msra.gmra.mxu2 %vm486_vm4, %v485_v29 }
 0x2aa   : > { %v506_v41 = vpop.f32.mrf.mxu2 }
 0x2ab   : > { %v514_v42 = vadd.f32 %v513_v40, %v506_v41 }
 0x2ad   : > { %516 = vrot.lane.b32.xlu2 %v514_v42, %s674_s8 }
 0x307   : > { %v517_v13 = vpop.permute.xlu2 %516 }
 0x308   : > { %v519_v43 = vsel %vm486_vm4, %v457_v20, %v517_v13 }
 0x309   : > { %v521_v44 = vsel %vm520_vm9, %v519_v43, 0.0 }
 0x30a   : > { %522 = vst [vmem:[%s248_s11] sm:$0x1] %v521_v44 }
 0x30b PF: > { %s15_s20 = sadd.s32 1, %s667_s20   ;;  %s826_s18 = smov %s663_s19 }
 0x30c   : > { %p12_p5 = scmp.ge.s32.totalorder %s15_s20, 4   ;;  %s827_s19 = smov %s829_s21 }
 0x30e   :  { %14 = sbr.rel (!%p12_p5) target bundleno = 2 (0x2), region = 78 }

</bundles_post_ra>
